<compile_context>
chip_gen: v6e
topology: v6e:2x2x1
jax: 0.10.0
libtpu: 0.0.40
codegen_flags: <defaults>
</compile_context>

<pallas_src>
import functools

import jax
import jax.numpy as jnp
from jax.experimental import pallas as pl
from jax.experimental.pallas import tpu as pltpu


def _round_up(x, m):
    return (x + m - 1) // m * m


def _dcl_kernel(q_ref, k_ref, out_ref, m_sc, l_sc, *,
                batch, b_pad_k, block_q, block_k, padded_keys):
    """One (block_q, block_k) tile of the online logsumexp over stacked keys."""
    qi = pl.program_id(0)
    ki = pl.program_id(1)
    neg_big = jnp.float32(-1e30)

    @pl.when(ki == 0)
    def _():
        m_sc[...] = jnp.full(m_sc.shape, -jnp.inf, dtype=jnp.float32)
        l_sc[...] = jnp.zeros(l_sc.shape, dtype=jnp.float32)

    # Single MXU matmul over the stacked key tile; feature axis contracted
    # directly (no explicit transpose). Query is pre-scaled by 1/T.
    dn = (((1,), (1,)), ((), ()))
    s = jax.lax.dot_general(q_ref[...], k_ref[...], dn,
                            preferred_element_type=jnp.float32)

    # Global row / key indices of this tile.
    row_g = qi * block_q + jax.lax.broadcasted_iota(
        jnp.int32, (block_q, block_k), 0)
    kg = ki * block_k + jax.lax.broadcasted_iota(
        jnp.int32, (block_q, block_k), 1)

    # Each key tile lies entirely in one half (block_k divides b_pad_k), so
    # the anchor-vs-positive half select is a SCALAR, not a full-tile where.
    is_pos_half = (ki * block_k) >= b_pad_k
    col_off = jnp.where(is_pos_half, batch - b_pad_k, 0)   # scalar int32
    concat_col = kg + col_off                               # column in concat(aa, ap)

    # neg_mask = eye(B).repeat_interleave(2, dim=1): row i has +1 at
    # concatenated columns 2i and 2i+1  ->  one compare per tile.
    mask = (concat_col >> 1) == row_g
    x = s + mask.astype(jnp.float32)

    if padded_keys:  # trace-time: only emitted when the batch was padded
        local_k = kg - jnp.where(is_pos_half, b_pad_k, 0)
        x = jnp.where(local_k < batch, x, neg_big)

    # ---- online logsumexp update ----
    m_prev = m_sc[...]
    m_new = jnp.maximum(m_prev, x.max(axis=1, keepdims=True))
    alpha = jnp.exp(m_prev - m_new)
    l_sc[...] = alpha * l_sc[...] + jnp.exp(x - m_new).sum(axis=1, keepdims=True)
    m_sc[...] = m_new

    @pl.when(ki == pl.num_programs(1) - 1)
    def _():
        out_ref[...] = m_sc[...] + jnp.log(l_sc[...])


def dcl_loss(anchor, positive, temperature=1.0, *,
             block_q=256, block_k=256, mxu_bf16=False):
    """Pallas TPU implementation of DCL.forward(anchor, positive)."""
    assert anchor.ndim == 2 and anchor.shape == positive.shape
    batch, dim = anchor.shape
    inv_t = 1.0 / float(temperature)

    # ---- F.normalize hoisted out of the kernel (done exactly once) ----
    a = anchor.astype(jnp.float32)
    p = positive.astype(jnp.float32)
    a_n = a * jax.lax.rsqrt(jnp.maximum(jnp.sum(a * a, axis=1, keepdims=True),
                                        1e-24))
    p_n = p * jax.lax.rsqrt(jnp.maximum(jnp.sum(p * p, axis=1, keepdims=True),
                                        1e-24))

    # Positive (diag) term: row-wise dot, kept in f32, independent of the kernel.
    pos = -jnp.sum(a_n * p_n, axis=1) * inv_t                       # (batch,)

    # ---- tile selection ----
    bq = _round_up(min(int(block_q), _round_up(batch, 8)), 8)
    if batch > 8 and _round_up(batch, bq) // bq < 2:
        # Guarantee >=2 query tiles so both v7x TensorCores get work.
        bq = _round_up(-(-batch // 2), 8)
    bk = _round_up(min(int(block_k), _round_up(batch, 8)), 8)

    b_pad_q = _round_up(batch, bq)
    b_pad_k = _round_up(batch, bk)
    # Sentinel-safety invariant: every key tile has >=1 valid column.
    assert b_pad_k - bk < batch
    d_pad = _round_up(dim, 128)   # aligned MXU K / full vreg lanes

    stream_dtype = jnp.bfloat16 if mxu_bf16 else jnp.float32

    # Query stream: 1/T folded in once; padded (rows are zeros -> harmless).
    q = (a_n * inv_t).astype(stream_dtype)
    q = jnp.pad(q, ((0, b_pad_q - batch), (0, d_pad - dim)))
    # Stacked key stream: [anchor_n ; positive_n]  -> one (block_k, D) DMA and
    # one N-wide matmul per step.
    keys = jnp.concatenate([
        jnp.pad(a_n.astype(stream_dtype),
                ((0, b_pad_k - batch), (0, d_pad - dim))),
        jnp.pad(p_n.astype(stream_dtype),
                ((0, b_pad_k - batch), (0, d_pad - dim))),
    ], axis=0)                                                      # (2*b_pad_k, d_pad)

    grid = (b_pad_q // bq, (2 * b_pad_k) // bk)

    kernel = functools.partial(
        _dcl_kernel, batch=batch, b_pad_k=b_pad_k,
        block_q=bq, block_k=bk, padded_keys=(b_pad_k != batch))

    # Set an explicit VMEM limit only when the estimate exceeds the default
    # scoped budget (matters for large block_q/D, esp. v7x's 64 MiB physical).
    itemsize = 2 if mxu_bf16 else 4
    est = (2 * (bq + bk) * d_pad * itemsize   # double-buffered input streams
           + 4 * bq * bk * 4                  # score temporaries / headroom
           + 4 * bq * 4)                      # scratch + output
    vmem_limit = None
    if est > 30 * 1024 * 1024:
        vmem_limit = min(int(est * 1.5), 100 * 1024 * 1024)

    # TODO(synk): sweep pipeline_mode=pl.Buffered(3) on the key spec (and a
    # single buffer on the ki-invariant query spec) for small-D latency hiding.
    neg = pl.pallas_call(
        kernel,
        out_shape=jax.ShapeDtypeStruct((b_pad_q, 1), jnp.float32),
        grid_spec=pltpu.PrefetchScalarGridSpec(
            num_scalar_prefetch=0,
            grid=grid,
            in_specs=[
                pl.BlockSpec((bq, d_pad), lambda qi, ki: (qi, 0)),  # queries
                pl.BlockSpec((bk, d_pad), lambda qi, ki: (ki, 0)),  # stacked keys
            ],
            out_specs=pl.BlockSpec((bq, 1), lambda qi, ki: (qi, 0)),
            scratch_shapes=[pltpu.VMEM((bq, 1), jnp.float32),
                            pltpu.VMEM((bq, 1), jnp.float32)],
        ),
        compiler_params=pltpu.CompilerParams(
            dimension_semantics=("parallel", "arbitrary"),
            vmem_limit_bytes=vmem_limit),
    )(q, keys)

    return jnp.mean(pos + neg[:batch, 0])


def _dcl_reference(anchor, positive, temperature=1.0):
    """Plain-JAX transcription of the PyTorch DCL.forward."""
    hi = jax.lax.Precision.HIGHEST
    a = anchor.astype(jnp.float32)
    p = positive.astype(jnp.float32)
    a = a / jnp.maximum(jnp.sqrt(jnp.sum(a * a, axis=1, keepdims=True)), 1e-12)
    p = p / jnp.maximum(jnp.sqrt(jnp.sum(p * p, axis=1, keepdims=True)), 1e-12)
    sim = jnp.matmul(a, p.T, precision=hi)
    b = anchor.shape[0]
    pos = -jnp.diag(sim) / temperature
    neg_sim = jnp.concatenate([jnp.matmul(a, a.T, precision=hi), sim],
                              axis=1) / temperature
    mask = jnp.repeat(jnp.eye(b, dtype=jnp.float32), 2, axis=1)
    neg = jax.scipy.special.logsumexp(neg_sim + mask, axis=1)
    return jnp.mean(pos + neg)


if __name__ == "__main__":
    key = jax.random.PRNGKey(0)
    k1, k2, k3, k4 = jax.random.split(key, 4)

    # Case 1: small batch, single query tile (B=8, D=32 -> D padded to 128).
    b1, d1 = 8, 32
    a1 = jax.random.normal(k1, (b1, d1), dtype=jnp.float32)
    p1 = jax.random.normal(k2, (b1, d1), dtype=jnp.float32)
    out1 = jax.block_until_ready(dcl_loss(a1, p1, temperature=0.5))
    ref1 = _dcl_reference(a1, p1, temperature=0.5)
    assert jnp.allclose(out1, ref1, rtol=1e-4, atol=1e-4), (out1, ref1)

    # Case 2: B=20 with batch padding; default tiles -> 2 query tiles (v7x-friendly).
    b2, d2 = 20, 48
    a2 = jax.random.normal(k3, (b2, d2), dtype=jnp.float32)
    p2 = jax.random.normal(k4, (b2, d2), dtype=jnp.float32)
    ref2 = _dcl_reference(a2, p2)
    out2 = jax.block_until_ready(dcl_loss(a2, p2))
    assert jnp.allclose(out2, ref2, rtol=1e-4, atol=1e-4), (out2, ref2)

    # Case 2b: tiny explicit tiles -> many grid steps with padded key tiles.
    out2b = jax.block_until_ready(dcl_loss(a2, p2, block_q=8, block_k=8))
    assert jnp.allclose(out2b, ref2, rtol=1e-4, atol=1e-4), (out2b, ref2)

    # Case 3: bf16-streamed queries/keys (f32 accumulation) -> looser tolerance.
    out3 = jax.block_until_ready(dcl_loss(a1, p1, mxu_bf16=True))
    ref3 = _dcl_reference(a1, p1)
    assert jnp.allclose(out3, ref3, rtol=3e-2, atol=3e-2), (out3, ref3)

    print("KERNEL_OK")
</pallas_src>

<mosaic_0001>
module attributes {stable_mosaic.version = 11 : i64} {
  func.func @_dcl_kernel(%arg0: i32, %arg1: i32, %arg2: memref<8x128xf32, #tpu.memory_space<vmem>>, %arg3: memref<8x128xf32, #tpu.memory_space<vmem>>, %arg4: memref<8x1xf32, #tpu.memory_space<vmem>>, %arg5: memref<8x1xf32, #tpu.memory_space<vmem>>, %arg6: memref<8x1xf32, #tpu.memory_space<vmem>>) attributes {dimension_semantics = [#tpu.dimension_semantics<parallel>, #tpu.dimension_semantics<arbitrary>], iteration_bounds = array<i64: 1, 2>, scalar_prefetch = 0 : i64, scratch_operands = 2 : i64, tpu.core_type = #tpu.core_type<tc>, window_params = [{transform_indices = @transform_0, window_bounds = array<i64: 8, 128>}, {transform_indices = @transform_1, window_bounds = array<i64: 8, 128>}, {transform_indices = @transform_2, window_bounds = array<i64: 8, 1>}]} {
    %c0_i32 = arith.constant 0 : i32
    %0 = arith.cmpi eq, %arg1, %c0_i32 : i32
    %1 = arith.extui %0 : i1 to i32
    %c0_i32_0 = arith.constant 0 : i32
    %2 = arith.cmpi ne, %1, %c0_i32_0 : i32
    scf.if %2 {
      %cst_21 = arith.constant 0xFF800000 : f32
      %44 = vector.broadcast %cst_21 : f32 to vector<8x1xf32>
      %c0_22 = arith.constant 0 : index
      %c0_23 = arith.constant 0 : index
      %45 = vector.load %arg5[%c0_22, %c0_23] : memref<8x1xf32, #tpu.memory_space<vmem>>, vector<8x1xf32>
      tpu.vector_store %arg5[%c0_22, %c0_23], %44 {strides = array<i32>} : memref<8x1xf32, #tpu.memory_space<vmem>>, vector<8x1xf32>,
      %cst_24 = arith.constant 0.000000e+00 : f32
      %46 = vector.broadcast %cst_24 : f32 to vector<8x1xf32>
      %c0_25 = arith.constant 0 : index
      %c0_26 = arith.constant 0 : index
      %47 = vector.load %arg6[%c0_25, %c0_26] : memref<8x1xf32, #tpu.memory_space<vmem>>, vector<8x1xf32>
      tpu.vector_store %arg6[%c0_25, %c0_26], %46 {strides = array<i32>} : memref<8x1xf32, #tpu.memory_space<vmem>>, vector<8x1xf32>,
    } else {
    }
    %c0 = arith.constant 0 : index
    %c0_1 = arith.constant 0 : index
    %3 = vector.load %arg2[%c0, %c0_1] : memref<8x128xf32, #tpu.memory_space<vmem>>, vector<8x128xf32>
    %c0_2 = arith.constant 0 : index
    %c0_3 = arith.constant 0 : index
    %4 = vector.load %arg3[%c0_2, %c0_3] : memref<8x128xf32, #tpu.memory_space<vmem>>, vector<8x128xf32>
    %cst = arith.constant dense<0.000000e+00> : vector<8x8xf32>
    %5 = tpu.matmul %3, %4, %cst {dimension_numbers = #tpu.dot_dimension_numbers<[1], [1], [0], [0], [0, 0, 1, 0], [], []>} : vector<8x128xf32>, vector<8x128xf32>, vector<8x8xf32> -> vector<8x8xf32>
    %c8_i32 = arith.constant 8 : i32
    %6 = arith.muli %arg0, %c8_i32 : i32
    %7 = tpu.iota {dimensions = array<i32: 0>} : vector<8x8xi32>
    %8 = vector.broadcast %6 : i32 to vector<8x8xi32>
    %9 = arith.addi %8, %7 : vector<8x8xi32>
    %c8_i32_4 = arith.constant 8 : i32
    %10 = arith.muli %arg1, %c8_i32_4 : i32
    %11 = tpu.iota {dimensions = array<i32: 1>} : vector<8x8xi32>
    %12 = vector.broadcast %10 : i32 to vector<8x8xi32>
    %13 = arith.addi %12, %11 : vector<8x8xi32>
    %c8_i32_5 = arith.constant 8 : i32
    %14 = arith.muli %arg1, %c8_i32_5 : i32
    %c8_i32_6 = arith.constant 8 : i32
    %15 = arith.cmpi sge, %14, %c8_i32_6 : i32
    %c0_i32_7 = arith.constant 0 : i32
    %c0_i32_8 = arith.constant 0 : i32
    %16 = arith.select %15, %c0_i32_7, %c0_i32_8 : i32
    %17 = vector.broadcast %16 : i32 to vector<8x8xi32>
    %18 = arith.addi %13, %17 : vector<8x8xi32>
    %c1_i32 = arith.constant 1 : i32
    %19 = vector.broadcast %c1_i32 : i32 to vector<8x8xi32>
    %20 = arith.shrsi %18, %19 : vector<8x8xi32>
    %21 = arith.cmpi eq, %20, %9 : vector<8x8xi32>
    %22 = arith.extui %21 : vector<8x8xi1> to vector<8x8xi32>
    %23 = arith.sitofp %22 : vector<8x8xi32> to vector<8x8xf32>
    %24 = arith.addf %5, %23 : vector<8x8xf32>
    %c0_9 = arith.constant 0 : index
    %c0_10 = arith.constant 0 : index
    %25 = vector.load %arg5[%c0_9, %c0_10] : memref<8x1xf32, #tpu.memory_space<vmem>>, vector<8x1xf32>
    %cst_11 = arith.constant dense<0xFF800000> : vector<8xf32>
    %26 = vector.multi_reduction <maximumf>, %24, %cst_11 [1] : vector<8x8xf32> to vector<8xf32>
    %27 = vector.shape_cast %26 : vector<8xf32> to vector<8x1xf32>
    %28 = arith.maximumf %25, %27 : vector<8x1xf32>
    %29 = arith.subf %25, %28 : vector<8x1xf32>
    %30 = math.exp %29 : vector<8x1xf32>
    %c0_12 = arith.constant 0 : index
    %c0_13 = arith.constant 0 : index
    %31 = vector.load %arg6[%c0_12, %c0_13] : memref<8x1xf32, #tpu.memory_space<vmem>>, vector<8x1xf32>
    %32 = arith.mulf %30, %31 : vector<8x1xf32>
    %33 = vector.broadcast %28 : vector<8x1xf32> to vector<8x8xf32>
    %34 = arith.subf %24, %33 : vector<8x8xf32>
    %35 = math.exp %34 : vector<8x8xf32>
    %cst_14 = arith.constant dense<0.000000e+00> : vector<8xf32>
    %36 = vector.multi_reduction <add>, %35, %cst_14 [1] : vector<8x8xf32> to vector<8xf32>
    %37 = vector.shape_cast %36 : vector<8xf32> to vector<8x1xf32>
    %38 = arith.addf %32, %37 : vector<8x1xf32>
    %c0_15 = arith.constant 0 : index
    %c0_16 = arith.constant 0 : index
    %39 = vector.load %arg6[%c0_15, %c0_16] : memref<8x1xf32, #tpu.memory_space<vmem>>, vector<8x1xf32>
    tpu.vector_store %arg6[%c0_15, %c0_16], %38 {strides = array<i32>} : memref<8x1xf32, #tpu.memory_space<vmem>>, vector<8x1xf32>,
    %c0_17 = arith.constant 0 : index
    %c0_18 = arith.constant 0 : index
    %40 = vector.load %arg5[%c0_17, %c0_18] : memref<8x1xf32, #tpu.memory_space<vmem>>, vector<8x1xf32>
    tpu.vector_store %arg5[%c0_17, %c0_18], %28 {strides = array<i32>} : memref<8x1xf32, #tpu.memory_space<vmem>>, vector<8x1xf32>,
    %c1_i32_19 = arith.constant 1 : i32
    %41 = arith.cmpi eq, %arg1, %c1_i32_19 : i32
    %42 = arith.extui %41 : i1 to i32
    %c0_i32_20 = arith.constant 0 : i32
    %43 = arith.cmpi ne, %42, %c0_i32_20 : i32
    scf.if %43 {
      %c0_21 = arith.constant 0 : index
      %c0_22 = arith.constant 0 : index
      %44 = vector.load %arg5[%c0_21, %c0_22] : memref<8x1xf32, #tpu.memory_space<vmem>>, vector<8x1xf32>
      %c0_23 = arith.constant 0 : index
      %c0_24 = arith.constant 0 : index
      %45 = vector.load %arg6[%c0_23, %c0_24] : memref<8x1xf32, #tpu.memory_space<vmem>>, vector<8x1xf32>
      %46 = math.log %45 : vector<8x1xf32>
      %47 = arith.addf %44, %46 : vector<8x1xf32>
      %c0_25 = arith.constant 0 : index
      %c0_26 = arith.constant 0 : index
      %48 = vector.load %arg4[%c0_25, %c0_26] : memref<8x1xf32, #tpu.memory_space<vmem>>, vector<8x1xf32>
      tpu.vector_store %arg4[%c0_25, %c0_26], %47 {strides = array<i32>} : memref<8x1xf32, #tpu.memory_space<vmem>>, vector<8x1xf32>,
    } else {
    }
    return
  }
  func.func @transform_0(%arg0: i32, %arg1: i32) -> (i32, i32) {
    %c0_i32 = arith.constant 0 : i32
    %c0_i32_0 = arith.constant 0 : i32
    return %arg0, %c0_i32 : i32, i32
  }
  func.func @transform_1(%arg0: i32, %arg1: i32) -> (i32, i32) {
    %c0_i32 = arith.constant 0 : i32
    %c0_i32_0 = arith.constant 0 : i32
    return %arg1, %c0_i32 : i32, i32
  }
  func.func @transform_2(%arg0: i32, %arg1: i32) -> (i32, i32) {
    %c0_i32 = arith.constant 0 : i32
    %c0_i32_0 = arith.constant 0 : i32
    return %arg0, %c0_i32 : i32, i32
  }
}

</mosaic_0001>

<bundles_post_ra>
// kernel: tpu_custom_call.1
= control target key start
LH: loop header
LB: loop body
LE: loop exit
PB: predicated region body
PF: predicated region fallthrough
CT: control target
= control target key end

     0   :  { %7 = vsyncpa [#allocation5], 0  ;;  %s764_s0 = inlined_call_operand.hbm [shape: f32[8,128], index: 0, kind: input, shape index: {}]   ;;  %s765_s1 = inlined_call_operand.hbm [shape: f32[16,128], index: 1, kind: input, shape index: {}]   ;;  %s766_s2 = inlined_call_operand.vmem [shape: f32[8,1], index: 2, kind: output, shape index: {}]  }
   0x1   :  { %8 = vsyncpa [#allocation7], 0 }
   0x2   :  { %10 = vsyncpa [#allocation7 + $0x1], 0  ;;  %s637_s9 = smov 0   ;;  %s639_s10 = smov 0  }
   0x3   :  { %s641_s11 = smov 0   ;;  %s643_s12 = smov 0  }
   0x4   :  { %s645_s13 = smov 0   ;;  %s647_s14 = smov 0  }
   0x5 LB: > { %s404_s15 = sadd.s32 4294967295, %s613_s14   ;;  %p74_p0 = scmp.ne.s32.totalorder %s597_s10, %s593_s9  ;;  %s613_s14 = sphi %s647_s14, %s16_s14   ;;  %s609_s13 = sphi %s645_s13, %s776_s13   ;;  %s605_s12 = sphi %s643_s12, %s775_s12   ;;  %s601_s11 = sphi %s641_s11, %s774_s11   ;;  %s597_s10 = sphi %s639_s10, %s773_s10   ;;  %s593_s9 = sphi %s637_s9, %s772_s9  }
   0x6   : > { %p667_p1 = scmp.eq.s32.totalorder %s404_s15, 0  ;;  %p405_p2 = scmp.ge.s32.totalorder %s613_s14, 1 }
   0x7   : > { %p111_p3 = scmp.lt.s32.totalorder %s613_s14, 3  ;;  %s615_s19 = smov [#allocation4]  }
   0x8   : > { %p675_p4 = por %p667_p1, %p74_p0  ;;  %s126_s20 = sshll.u32 %s615_s19, 4  ;;  %s127_s20 = int_to_ptr.vmem [resolvable:$true] %s126_s20 }
   0x9   : > { %p679_p5 = pnand %p405_p2, %p111_p3  ;;  %s25_s22 = sadd.s32 1, %s609_s13 }
   0xa   : > { %s61_s23 = sadd.s32 1, %s601_s11  ;;  %p26_p8 = scmp.ge.s32.totalorder %s25_s22, 2 }
   0xb   : > { %p433_p6 = pneg %p679_p5  ;;  %s516_s24 = scalar_lea.vmem %s127_s20, 128 }
   0xc   : > { %p517_p10 = scmp.ne.s32.totalorder %s127_s20, %s516_s24  ;;  %p524_p13 = scmp.lt.s32.totalorder %s127_s20, %s127_s20 }
   0xd   : > { %p687_p7 = pnand %p433_p6, %p667_p1  ;;  %p525_p0 = scmp.lt.s32.totalorder %s516_s24, %s516_s24 }
   0xf   : > { %p507_p9 = pneg %p687_p7  ;;  %p526_p2 = por %p525_p0, %p524_p13 }
  0x11   : > { %p519_p11 = pnand %p517_p10, %p507_p9 }
  0x13   : > { %p520_p12 = pneg %p519_p11 }
  0x15   : > { %p527_p3 = pnand %p526_p2, %p520_p12 }
  0x17   : > { %530 = shalt.err (!%p527_p3)
}
  0x18   : > { %436 = dma.hbm_to_vmem [thread:$0]  (!%p687_p7), %s764_s0, 128, %s127_s20, [#allocation5]  }
  0x19   : > { %s778_s22 = smov (%p26_p8, %s25_s22), 0  ;;  %p68_p6 = scmp.ne.s32.totalorder %s601_s11, %s597_s10 }
  0x1a   : > { %p69_p9 = scmp.eq.s32.totalorder %s613_s14, 0  ;;  %s58_s27 = ssub.s32 %s609_s13, %s778_s22 }
  0x1b   : > { %p442_p10 = scmp.lt.s32.totalorder %s613_s14, 2  ;;  %p59_p11 = scmp.eq.s32.totalorder %s58_s27, 0 }
  0x1c   : > { %p70_p12 = por %p69_p9, %p68_p6  ;;  %s137_s28 = sand.u32 1, %s601_s11  }
  0x1d   : > { %s409_s29 = sshll.u32 %s609_s13, 7  ;;  %s408_s3 = sshll.u32 %s137_s28, 3 }
  0x1e   : > { %s711_s30 = scalar_select %p59_p11, %s601_s11, %s61_s23  }
  0x1f   : > { %s146_s6 = scalar_lea.hbm %s765_s1, %s409_s29  ;;  %s141_s7 = scalar_lea.vmem [#allocation6], %s408_s3 }
  0x20   : > { %s148_s8 = sshll.u32 %s141_s7, 4  ;;  %p716_p7 = pnand %p442_p10, %p70_p12  ;;  %s149_s8 = int_to_ptr.vmem [resolvable:$true] %s148_s8 }
  0x21   : > { %s138_s15 = scalar_lea.sflag [#allocation7], %s137_s28  ;;  %s544_s19 = scalar_lea.vmem %s149_s8, 128 }
  0x22   : > { %p533_p8 = pneg %p716_p7  ;;  %p545_p13 = scmp.ne.s32.totalorder %s149_s8, %s544_s19 }
  0x23   : > { %s616_s20 = smov [#allocation6]  }
  0x24   : > { %p547_p0 = pnand %p545_p13, %p533_p8  ;;  %s549_s21 = sshll.u32 %s616_s20, 4  ;;  %s550_s21 = int_to_ptr.vmem [resolvable:$false] %s549_s21 }
  0x25   : > { %s551_s23 = scalar_lea.vmem %s550_s21, 256  ;;  %p552_p3 = scmp.lt.s32.totalorder %s149_s8, %s550_s21 }
  0x26   : > { %p548_p2 = pneg %p547_p0  ;;  %p553_p6 = scmp.lt.s32.totalorder %s551_s23, %s544_s19 }
  0x28   : > { %p554_p9 = por %p553_p6, %p552_p3 }
  0x2a   : > { %p555_p10 = pnand %p554_p9, %p548_p2 }
  0x2c   : > { %558 = shalt.err (!%p555_p10)
}
  0x2d   : > { %440 = dma.hbm_to_vmem [thread:$0]  (!%p716_p7), %s146_s6, 128, %s149_s8, %s138_s15  }
  0x2e   : > { %157 = sbr.rel (%p679_p5) target bundleno = 716 (0x2cc), region = 28 }
  0x33   : > { %584 = dma.done.wait (%p667_p1), [#allocation5], 128  }
  0x34   : > { %586 = vsyncadd (%p667_p1), [#allocation5], 4294967168  ;;  %s163_s24 = sand.u32 1, %s597_s10  }
  0x35   : > { %s412_s25 = sshll.u32 %s163_s24, 3  ;;  %s164_s26 = scalar_lea.sflag [#allocation7], %s163_s24 }
  0x36   : > { %s167_s27 = scalar_lea.vmem [#allocation6], %s412_s25 }
  0x37   : > { %588 = dma.done.wait (%p675_p4), %s164_s26, 128  }
  0x38   : > { %590 = vsyncadd (%p675_p4), %s164_s26, 4294967168  ;;  %p413_p11 = scmp.ne.s32.totalorder %s605_s12, 0 }
  0x3a   : > { %194 = sbr.rel (%p413_p11) target bundleno = 65 (0x41), region = 40 }
  0x3f   : > { %vm195_vm0 = vcmask 7168   ;;  %v617_v0 = vmov -inf   ;;  %v618_v1 = vmov 0.0  }
  0x40   : > { %196 = vst.msk [vmem:[#allocation2] sm:$0xff] %vm195_vm0, %v617_v0  ;;  %197 = vst.msk [vmem:[#allocation3] sm:$0xff] %vm195_vm0, %v618_v1 }
  0x41 PF: > { %v199_v2 = vld [vmem:[%s167_s27] sm:$0xff]  ;;  %v619_v3 = vmov 0.0   ;;  %vm620_vm1 = vmmov 0   ;;  %v198_v4 = vld [vmem:[#allocation4] sm:$0xff]  ;;  %v201_v5 = vlaneseq  ;;  %s414_s16 = sshll.u32 %s605_s12, 3  ;;  %vm285_vm3 = vcmask 64512  }
  0x42   : > { %422 = vmatprep.subr.mxu0 %v619_v3  ;;  %424 = vmatprep.mubr.msk.f32.mxu0 %vm620_vm1, %v619_v3  ;;  %v208_v7 = vstv %s414_s16  ;;  %v621_v16 = vmov 0   ;;  %vm307_vm4 = vcmask 7168   ;;  %p416_p1 = scmp.ne.s32.totalorder %s605_s12, 1 }
  0x43   : > { %423 = vmatpush3.xpose.msra.mxu0 %v199_v2  ;;  %v207_v6 = vand.u32 127, %v201_v5  ;;  %v202_v9 = vshrl.u32 %v201_v5, 7  ;;  %498 = vset.pattern.permute.xlu0 %v621_v16 }
  0x45   : > { %v209_v8 = vadd.s32 %v208_v7, %v207_v6 }
  0x46   : > { %425 = vmatmul.mubr.f32.vlgmr.msra.gmra.mxu0 %v198_v4 }
  0x47   : > { %v210_v10 = vshra.s32 %v209_v8, 1  ;;  %v284_v17 = vld [vmem:[#allocation2] sm:$0xff]  ;;  %v293_v28 = vld [vmem:[#allocation3] sm:$0xff] }
  0x49   : > { %vm211_vm2 = vcmp.eq.s32.totalorder %v210_v10, %v202_v9 }
  0x4a   : > { %v415_v11 = vsel %vm211_vm2, 1.0, %v619_v3 }
 0x106   : > { %v280_v12 = vpop.f32.mrf.mxu0 }
 0x107   : > { %v281_v13 = vadd.f32 %v415_v11, %v280_v12 }
 0x108   : > { %v426_v14 = vpop.f32.mrf.mxu0 }
 0x109   : > { %v286_v15 = vsel %vm285_vm3, %v281_v13, -inf }
 0x10a   : > { %287 = vmax.xlane.f32.xlu0 %v286_v15 }
 0x193   : > { %v288_v18 = vpop.xlane.xlu0 %287 }
 0x194   : > { %v289_v19 = vmax.f32 %v284_v17, %v288_v18 }
 0x196   : > { %v290_v20 = vsub.f32 %v284_v17, %v289_v19  ;;  %309 = vst.msk [vmem:[#allocation2] sm:$0xff] %vm307_vm4, %v289_v19  ;;  %297 = vperm.xlu0 %498, %v289_v19  }
 0x198   : > { %v291_v26 = vmul.f32 1.442695, %v290_v20 }
 0x211   : > { %v298_v21 = vpop.permute.xlu0 %297 }
 0x212   : > { %v300_v22 = vsub.f32 %v281_v13, %v298_v21 }
 0x214   : > { %v301_v23 = vmul.f32 1.442695, %v300_v22 }
 0x216   : > { %499 = vpow2.f32 %v301_v23 }
 0x217   : > { %501 = vpow2.f32 %v291_v26 }
 0x223   : > { %v500_v24 = vpop.eup %499 }
 0x224   : > { %v303_v25 = vsel %vm285_vm3, %v500_v24, 0.0  ;;  %v502_v27 = vpop.eup %501 }
 0x225   : > { %304 = vadd.xlane.f32.xlu1 %v303_v25  ;;  %v294_v29 = vmul.f32 %v502_v27, %v293_v28 }
 0x2ad   : > { %313 = sbr.rel (%p416_p1) target bundleno = 716 (0x2cc), region = 44 }
 0x2ae   : > { %v305_v30 = vpop.xlane.xlu1 %304 }
 0x2af   : > { %v306_v31 = vadd.f32 %v305_v30, %v294_v29 }
 0x2b1   : > { %308 = vst.msk [vmem:[#allocation3] sm:$0xff] %vm307_vm4, %v306_v31 }
 0x2b2   : > { %v314_v34 = vld [vmem:[#allocation2] sm:$0xff] }
 0x2b8   : > { %v315_v32 = vld [vmem:[#allocation3] sm:$0xff] }
 0x2b9   : > { %503 = vlog2.f32 %v315_v32 }
 0x2c6   : > { %v504_v33 = vpop.eup %503 }
 0x2c7   : > { %v317_v35 = vmul.f32 0.6931472, %v504_v33 }
 0x2c9   : > { %v318_v36 = vadd.f32 %v317_v35, %v314_v34 }
 0x2cb   : > { %319 = vst.msk [vmem:[%s766_s2] sm:$0xff] %vm307_vm4, %v318_v36 }
 0x2cc PF: > { %s16_s14 = sadd.s32 1, %s613_s14   ;;  %s772_s9 = smov %s597_s10 }
 0x2cd   : > { %p13_p4 = scmp.ge.s32.totalorder %s16_s14, 4   ;;  %s773_s10 = smov %s601_s11 }
 0x2ce   : > { %s774_s11 = smov %s711_s30  ;;  %s775_s12 = smov %s609_s13 }
 0x2cf   : > { %s776_s13 = smov %s778_s22  ;;  %15 = sbr.rel (!%p13_p4) target bundleno = 5 (0x5), region = 82 }
 0x2d4   :  { %339 = vsyncpa [#allocation5], 1 }
 0x2d5   :  { %341 = vsyncpa [#allocation5 + $0x1], 1 }
 0x2d6   :  { %342 = vsyncpa [#allocation7], 1 }
 0x2d7   :  { %344 = vsyncpa [#allocation7 + $0x1], 1 }

</bundles_post_ra>
